<compile_context>
chip_gen: v7x
topology: tpu7x:2x2x1
jax: 0.10.0
libtpu: 0.0.40
codegen_flags: <defaults>
</compile_context>

<pallas_src>
import functools

import jax
import jax.numpy as jnp
from jax.experimental import pallas as pl
from jax.experimental.pallas import tpu as pltpu

_LANE = 128
_SUBLANE = 8


def _round_up(a: int, m: int) -> int:
    return (a + m - 1) // m * m


def _vmem_capacity_bytes() -> int:
    try:
        info = pltpu.get_tpu_info()
        cap = getattr(info, "vmem_capacity_bytes", None)
        if cap:
            return int(cap)
    except Exception:
        pass
    return 64 * 1024 * 1024  # conservative (v7x-sized) fallback


# --------------------------------------------------------------------------
# Fast path: W resident in VMEM, single pass per row tile.
# --------------------------------------------------------------------------
def _residual_fast_kernel(x_ref, w_ref, b_ref, o_ref):
    # x_ref: (TM, Dp) input dtype   w_ref: (Dp, Dp) bf16 (resident)
    # b_ref: (1, Dp) f32            o_ref: (TM, Dp) output dtype
    x = x_ref[...]
    acc = jnp.dot(x.astype(w_ref.dtype), w_ref[...],
                  preferred_element_type=jnp.float32)
    acc = acc + b_ref[...]                      # bias (f32)
    acc = acc + x.astype(jnp.float32)           # residual at input precision
    o_ref[...] = acc.astype(o_ref.dtype)


# --------------------------------------------------------------------------
# Large-D path: (rows, cols, K) grid, K innermost, f32 accumulator carry.
# --------------------------------------------------------------------------
def _residual_ktiled_kernel(x_ref, w_ref, b_ref, o_ref, acc_ref):
    # x_ref: (TM, TK) at (i, k)     w_ref: (TK, TN) bf16 at (k, j)
    # b_ref: (1, TN) f32 at (0, j)  o_ref: (TM, TN) at (i, j)
    # acc_ref: (TM, TN) f32 scratch, carried across the K axis.
    j = pl.program_id(1)
    k = pl.program_id(2)
    nk = pl.num_programs(2)

    x = x_ref[...]
    p = jnp.dot(x.astype(w_ref.dtype), w_ref[...],
                preferred_element_type=jnp.float32)

    @pl.when(k == 0)
    def _init():
        # First-iteration overwrite; bias folded into the accumulator init.
        acc_ref[...] = p + b_ref[...]

    @pl.when(k > 0)
    def _accum():
        acc_ref[...] += p

    # Residual: the x K-slice at step k covers exactly the columns of output
    # tile j when k == j (TN == TK, W square with identical row/col padding).
    @pl.when(k == j)
    def _residual():
        acc_ref[...] += x.astype(jnp.float32)

    @pl.when(k == nk - 1)
    def _store():
        o_ref[...] = acc_ref[...].astype(o_ref.dtype)


# --------------------------------------------------------------------------
# Wrapper
# --------------------------------------------------------------------------
@functools.partial(jax.jit, static_argnames=("force_k_tiling",))
def residual_linear(x, w, b, *, force_k_tiling: bool = False):
    """y = x + (x @ w + b);  x: (B, N, D), w: (D, D), b: (D,)."""
    B, N, D = x.shape
    M = B * N
    out_dtype = x.dtype
    x_it = jnp.dtype(x.dtype).itemsize
    o_it = jnp.dtype(out_dtype).itemsize

    w_dtype = jnp.bfloat16           # MXU operand dtype (f32 accumulation)
    w_it = 2

    cap = _vmem_capacity_bytes()
    budget = int(cap * 0.75)         # block budget (leave Mosaic headroom)
    vmem_limit = int(cap * 0.85)     # never hand Mosaic the whole VMEM

    # Lane-dense padding of the feature dim only (needed for matmul
    # correctness); rows are never padded — ragged tail row tiles are fine.
    D_pad = _round_up(D, _LANE)

    fast = (not force_k_tiling) and (D_pad * D_pad * w_it <= 8 * 1024 * 1024)
    if not fast and D_pad % 256 != 0:
        # K-tiled path: favour 256-wide K tiles (v6e/v7x MXU is 256 wide).
        D_pad = _round_up(D, 256)

    # Pad/cast parameters once (weights are typically static across calls).
    w2 = jnp.pad(w, ((0, D_pad - D), (0, D_pad - D))).astype(w_dtype)
    b2 = jnp.pad(b.reshape(1, D), ((0, 0), (0, D_pad - D))).astype(jnp.float32)
    x2 = x.reshape(M, D)
    if D_pad != D:
        x2 = jnp.pad(x2, ((0, 0), (0, D_pad - D)))

    TM = min(1024, _round_up(M, _SUBLANE))

    if fast:
        def est(tm):
            return (2 * tm * D_pad * x_it        # x blocks (double-buffered)
                    + 2 * D_pad * D_pad * w_it   # resident W (counted x2, safe)
                    + 2 * tm * D_pad * o_it      # out blocks
                    + 2 * D_pad * 4)             # bias
        while est(TM) > budget and TM > _SUBLANE:
            TM = max(_SUBLANE, (TM // 2) // _SUBLANE * _SUBLANE)

        grid = (pl.cdiv(M, TM),)
        cost = pl.CostEstimate(
            flops=2 * M * D_pad * D_pad + 4 * M * D_pad,
            transcendentals=0,
            bytes_accessed=int(M * D_pad * x_it + D_pad * D_pad * w_it
                               + D_pad * 4 + M * D_pad * o_it),
        )
        out = pl.pallas_call(
            _residual_fast_kernel,
            out_shape=jax.ShapeDtypeStruct((M, D_pad), out_dtype),
            grid=grid,
            in_specs=[
                pl.BlockSpec((TM, D_pad), lambda i: (i, 0)),      # x (row tiled)
                pl.BlockSpec((D_pad, D_pad), lambda i: (0, 0)),   # W (resident)
                pl.BlockSpec((1, D_pad), lambda i: (0, 0)),       # bias
            ],
            out_specs=pl.BlockSpec((TM, D_pad), lambda i: (i, 0)),
            compiler_params=pltpu.CompilerParams(
                dimension_semantics=("parallel",),
                vmem_limit_bytes=vmem_limit,
            ),
            cost_estimate=cost,
        )(x2, w2, b2)
        # TODO(synk): for decode-like shapes (single row tile, small D) on v7x,
        #             a column-parallel axis would let the second TensorCore work.
    else:
        TK = 512 if D_pad % 512 == 0 else (256 if D_pad % 256 == 0 else 128)

        def est(tm, tk):
            return (2 * tm * tk * x_it       # x blocks
                    + 2 * tk * tk * w_it     # W blocks (TN == TK)
                    + 2 * tm * tk * o_it     # out blocks
                    + tm * tk * 4            # f32 accumulator scratch
                    + 2 * tk * 4)            # bias
        while est(TM, TK) > budget:
            if TM > 128:
                TM = max(_SUBLANE, (TM // 2) // _SUBLANE * _SUBLANE)
            elif TK > 128:
                TK //= 2
            else:
                break
        TN = TK  # column tile == K tile -> residual aligns when k == j

        grid = (pl.cdiv(M, TM), D_pad // TN, D_pad // TK)
        n_row, n_col = grid[0], grid[1]
        cost = pl.CostEstimate(
            flops=2 * M * D_pad * D_pad + 4 * M * D_pad,
            transcendentals=0,
            bytes_accessed=int(n_col * M * D_pad * x_it        # x refetch per col tile
                               + n_row * D_pad * D_pad * w_it  # W refetch per row tile
                               + n_row * n_col * D_pad * 4     # bias
                               + M * D_pad * o_it),
        )
        out = pl.pallas_call(
            _residual_ktiled_kernel,
            out_shape=jax.ShapeDtypeStruct((M, D_pad), out_dtype),
            grid=grid,
            in_specs=[
                pl.BlockSpec((TM, TK), lambda i, j, k: (i, k)),   # x
                pl.BlockSpec((TK, TN), lambda i, j, k: (k, j)),   # W
                pl.BlockSpec((1, TN), lambda i, j, k: (0, j)),    # bias
            ],
            out_specs=pl.BlockSpec((TM, TN), lambda i, j, k: (i, j)),
            scratch_shapes=[pltpu.VMEM((TM, TN), jnp.float32)],
            compiler_params=pltpu.CompilerParams(
                dimension_semantics=("parallel", "parallel", "arbitrary"),
                vmem_limit_bytes=vmem_limit,
            ),
            cost_estimate=cost,
        )(x2, w2, b2)

    if D_pad != D:
        out = out[:, :D]
    return out.reshape(B, N, D)


if __name__ == "__main__":
    key = jax.random.PRNGKey(0)
    kx, kw, kb, kx2, kw2, kb2 = jax.random.split(key, 6)

    def ref_fn(x, w, b):
        return x + (jnp.einsum("bnd,de->bne", x, w) + b)

    # --- Case 1: small shape -> W-resident fast path (no K tiling) ---------
    B, N, D = 2, 8, 32
    x = jax.random.normal(kx, (B, N, D), dtype=jnp.float32)
    w = jax.random.normal(kw, (D, D), dtype=jnp.float32) * 0.02
    b = jax.random.normal(kb, (D,), dtype=jnp.float32) * 0.02

    y = residual_linear(x, w, b)
    jax.block_until_ready(y)
    y_ref = ref_fn(x, w, b)
    assert y.shape == y_ref.shape, "shape mismatch vs reference (fast path)"
    # fn(x) runs on the MXU in bf16 (f32 accumulation); residual kept in f32.
    assert jnp.allclose(y, y_ref, atol=2e-2, rtol=2e-2), "fast path mismatch"

    # --- Case 2: force the K-/column-tiled path (3 K tiles, 3 col tiles) ---
    B2, N2, D2 = 2, 8, 768
    xb = jax.random.normal(kx2, (B2, N2, D2), dtype=jnp.float32)
    wb = jax.random.normal(kw2, (D2, D2), dtype=jnp.float32) * 0.02
    bb = jax.random.normal(kb2, (D2,), dtype=jnp.float32) * 0.02

    y2 = residual_linear(xb, wb, bb, force_k_tiling=True)
    jax.block_until_ready(y2)
    y2_ref = ref_fn(xb, wb, bb)
    assert y2.shape == y2_ref.shape, "shape mismatch vs reference (k-tiled path)"
    assert jnp.allclose(y2, y2_ref, atol=5e-2, rtol=5e-2), "k-tiled path mismatch"

    print("KERNEL_OK")
</pallas_src>

<mosaic_0001>
module attributes {stable_mosaic.version = 11 : i64} {
  func.func @_residual_fast_kernel(%arg0: i32, %arg1: memref<16x128xf32, #tpu.memory_space<vmem>>, %arg2: memref<128x128xbf16, #tpu.memory_space<vmem>>, %arg3: memref<1x128xf32, #tpu.memory_space<vmem>>, %arg4: memref<16x128xf32, #tpu.memory_space<vmem>>) attributes {dimension_semantics = [#tpu.dimension_semantics<parallel>], iteration_bounds = array<i64: 1>, scalar_prefetch = 0 : i64, scratch_operands = 0 : i64, tpu.core_type = #tpu.core_type<tc>, window_params = [{transform_indices = @transform_0, window_bounds = array<i64: 16, 128>}, {pipeline_mode = #tpu.pipeline_mode<synchronous>, transform_indices = @transform_1, window_bounds = array<i64: 128, 128>}, {pipeline_mode = #tpu.pipeline_mode<synchronous>, transform_indices = @transform_2, window_bounds = array<i64: 1, 128>}, {transform_indices = @transform_3, window_bounds = array<i64: 16, 128>}]} {
    %c0 = arith.constant 0 : index
    %c0_0 = arith.constant 0 : index
    %0 = vector.load %arg1[%c0, %c0_0] : memref<16x128xf32, #tpu.memory_space<vmem>>, vector<16x128xf32>
    %1 = arith.truncf %0 : vector<16x128xf32> to vector<16x128xbf16>
    %c0_1 = arith.constant 0 : index
    %c0_2 = arith.constant 0 : index
    %2 = vector.load %arg2[%c0_1, %c0_2] : memref<128x128xbf16, #tpu.memory_space<vmem>>, vector<128x128xbf16>
    %cst = arith.constant dense<0.000000e+00> : vector<16x128xf32>
    %3 = tpu.matmul %1, %2, %cst {dimension_numbers = #tpu.dot_dimension_numbers<[1], [0], [0], [1], [0, 0, 1, 1], [], []>} : vector<16x128xbf16>, vector<128x128xbf16>, vector<16x128xf32> -> vector<16x128xf32>
    %c0_3 = arith.constant 0 : index
    %c0_4 = arith.constant 0 : index
    %4 = vector.load %arg3[%c0_3, %c0_4] : memref<1x128xf32, #tpu.memory_space<vmem>>, vector<1x128xf32>
    %5 = vector.broadcast %4 : vector<1x128xf32> to vector<16x128xf32>
    %6 = arith.addf %3, %5 : vector<16x128xf32>
    %7 = arith.addf %6, %0 : vector<16x128xf32>
    %c0_5 = arith.constant 0 : index
    %c0_6 = arith.constant 0 : index
    %8 = vector.load %arg4[%c0_5, %c0_6] : memref<16x128xf32, #tpu.memory_space<vmem>>, vector<16x128xf32>
    tpu.vector_store %arg4[%c0_5, %c0_6], %7 {strides = array<i32>} : memref<16x128xf32, #tpu.memory_space<vmem>>, vector<16x128xf32>,
    return
  }
  func.func @transform_0(%arg0: i32) -> (i32, i32) {
    %c0_i32 = arith.constant 0 : i32
    %c0_i32_0 = arith.constant 0 : i32
    return %arg0, %c0_i32 : i32, i32
  }
  func.func @transform_1(%arg0: i32) -> (i32, i32) {
    %c0_i32 = arith.constant 0 : i32
    %c0_i32_0 = arith.constant 0 : i32
    %c0_i32_1 = arith.constant 0 : i32
    return %c0_i32, %c0_i32_0 : i32, i32
  }
  func.func @transform_2(%arg0: i32) -> (i32, i32) {
    %c0_i32 = arith.constant 0 : i32
    %c0_i32_0 = arith.constant 0 : i32
    %c0_i32_1 = arith.constant 0 : i32
    return %c0_i32, %c0_i32_0 : i32, i32
  }
  func.func @transform_3(%arg0: i32) -> (i32, i32) {
    %c0_i32 = arith.constant 0 : i32
    %c0_i32_0 = arith.constant 0 : i32
    return %arg0, %c0_i32 : i32, i32
  }
}

</mosaic_0001>

<bundles_post_ra>
// kernel: residual_linear.1
= control target key start
LH: loop header
LB: loop body
LE: loop exit
PB: predicated region body
PF: predicated region fallthrough
CT: control target
= control target key end

     0   :  { %v186_v0 = vmov 0.0   ;;  %vm187_vm0 = vmmov 0   ;;  %s247_s1 = inlined_call_operand.vmem [shape: bf16[128,128], index: 1, kind: input, shape index: {}]   ;;  %s248_s0 = inlined_call_operand.vmem [shape: f32[16,128], index: 0, kind: input, shape index: {}]   ;;  %s249_s2 = inlined_call_operand.vmem [shape: f32[1,128], index: 2, kind: input, shape index: {}]   ;;  %s250_s3 = inlined_call_operand.vmem [shape: f32[16,128], index: 3, kind: output, shape index: {}]  }
   0x1   :  { %156 = vmatprep.subr.bf16.mxu0 %v186_v0  ;;  %v178_v1 = vld [vmem:[%s247_s1] sm:$0xff]   ;;  %172 = vmatprep.mubr.msk.bf16.mxu0 %vm187_vm0, %v186_v0  ;;  %v179_v2 = vld [vmem:[%s247_s1 + $0x8] sm:$0xff]   ;;  %v180_v3 = vld [vmem:[%s247_s1 + $0x10] sm:$0xff]  }
   0x2   :  { %157 = vmatpush3.bf16.msra.mxu0 %v178_v1  ;;  %v181_v4 = vld [vmem:[%s247_s1 + $0x18] sm:$0xff]   ;;  %v182_v5 = vld [vmem:[%s247_s1 + $0x20] sm:$0xff]   ;;  %v183_v6 = vld [vmem:[%s247_s1 + $0x28] sm:$0xff]  }
   0x3   :  { %158 = vmatprep.subr.bf16.mxu0 %v186_v0  ;;  %v184_v7 = vld [vmem:[%s247_s1 + $0x30] sm:$0xff]   ;;  %v185_v8 = vld [vmem:[%s247_s1 + $0x38] sm:$0xff]   ;;  %v15_v9 = vld [vmem:[%s248_s0] sm:$0xff] }
   0x4   :  { %v16_v10 = vld [vmem:[%s248_s0 + $0x8] sm:$0xff]  ;;  %v138_v12 = vld [vmem:[%s249_s2] ss:$0 sm:$0xff] }
   0x5   :  { %v17_v11 = vpack.c.bf16 %v16_v10, %v15_v9 }
   0x6   :  { %159 = vmatpush3.bf16.msra.mxu0 %v179_v2 }
   0x7   :  { %160 = vmatprep.subr.bf16.mxu0 %v186_v0 }
   0xa   :  { %161 = vmatpush3.bf16.msra.mxu0 %v180_v3 }
   0xb   :  { %162 = vmatprep.subr.bf16.mxu0 %v186_v0 }
   0xe   :  { %163 = vmatpush3.bf16.msra.mxu0 %v181_v4 }
   0xf   :  { %164 = vmatprep.subr.bf16.mxu0 %v186_v0 }
  0x12   :  { %165 = vmatpush3.bf16.msra.mxu0 %v182_v5 }
  0x13   :  { %166 = vmatprep.subr.bf16.mxu0 %v186_v0 }
  0x16   :  { %167 = vmatpush3.bf16.msra.mxu0 %v183_v6 }
  0x17   :  { %168 = vmatprep.subr.bf16.mxu0 %v186_v0 }
  0x1a   :  { %169 = vmatpush3.bf16.msra.mxu0 %v184_v7 }
  0x1b   :  { %170 = vmatprep.subr.bf16.mxu0 %v186_v0 }
  0x1e   :  { %171 = vmatpush3.bf16.msra.mxu0 %v185_v8 }
  0x21   :  { %173 = vmatmul.mubr.bf16.vlgmr.msra.gmra.mrb[0].mxu0 %v17_v11 }
  0xf4   :  { %v123_v13 = vpop.f32.mrb[0].mxu0 }
  0xf5   :  { %v124_v14 = vadd.f32 %v138_v12, %v123_v13  ;;  %v174_v15 = vpop.f32.mrb[1].mxu0 }
  0xf6   :  { %v126_v16 = vpop.f32.mrb[2].mxu0 }
  0xf7   :  { %v130_v17 = vadd.f32 %v124_v14, %v15_v9  ;;  %v127_v18 = vadd.f32 %v138_v12, %v126_v16  ;;  %v175_v19 = vpop.f32.mrb[3].mxu0 }
  0xf9   :  { %132 = vst [vmem:[%s250_s3] sm:$0xff] %v130_v17  ;;  %v131_v20 = vadd.f32 %v127_v18, %v16_v10 }
  0xfb   :  { %133 = vst [vmem:[%s250_s3 + $0x8] sm:$0xff] %v131_v20 }

</bundles_post_ra>
